<compile_context>
chip_gen: v6e
topology: v6e:2x2x1
jax: 0.10.0
libtpu: 0.0.40
codegen_flags: <defaults>
</compile_context>

<pallas_src>
import functools
import math

import jax
import jax.numpy as jnp
from jax import lax
from jax.experimental import pallas as pl
from jax.experimental.pallas import tpu as pltpu


def build_pos_enc(d_model: int, max_seq_length: int, dtype=jnp.float32):
    """Sin/cos table, shape (max_seq_length, 1, d_model), built in `dtype`.

    Building it in the model/activation dtype once avoids a per-forward
    HBM read+write cast of the whole table.
    """
    position = jnp.arange(max_seq_length, dtype=jnp.float32)[:, None]          # (L, 1)
    div_term = jnp.exp(
        jnp.arange(0, d_model, 2, dtype=jnp.float32) * -(math.log(10000.0) / d_model)
    )                                                                           # (D/2,)
    angles = position * div_term                                                # (L, D/2)
    pe = jnp.zeros((max_seq_length, d_model), dtype=jnp.float32)
    pe = pe.at[:, 0::2].set(jnp.sin(angles))
    pe = pe.at[:, 1::2].set(jnp.cos(angles))
    return pe[:, None, :].astype(dtype)                                         # (L, 1, D)


# ---------------------------------------------------------------------------
# Kernels (operate on the 2-D (S, B*D) view; pe block is (tile_s, D))
# ---------------------------------------------------------------------------

def _add_pe_kernel(x_ref, pe_ref, o_ref, *, batch):
    pe = pe_ref[...]                       # (tile_s, D)
    if batch > 1:
        pe = jnp.tile(pe, (1, batch))      # (tile_s, B*D) — lane replication
    o_ref[...] = x_ref[...] + pe


def _add_pe_dropout_kernel(seed_ref, x_ref, pe_ref, o_ref, *,
                           batch, tile_s, keep_threshold, keep_prob):
    pe = pe_ref[...]
    if batch > 1:
        pe = jnp.tile(pe, (1, batch))
    y = x_ref[...] + pe

    # Stateless counter-based RNG: hash (seed, global_row, col) with a
    # splitmix32-style mixer.  Pure uint32 VPU ops -> lowers on Mosaic and in
    # interpret mode; mixing the *global* row index decorrelates tiles.
    shape = y.shape
    row_off = jnp.uint32(tile_s) * pl.program_id(0).astype(jnp.uint32)
    rows = lax.broadcasted_iota(jnp.uint32, shape, 0) + row_off
    cols = lax.broadcasted_iota(jnp.uint32, shape, 1)
    seed = seed_ref[0].astype(jnp.uint32)

    h = rows * jnp.uint32(0x9E3779B1) + seed
    h = h ^ (cols * jnp.uint32(0x85EBCA77) + jnp.uint32(0x165667B1))
    h = (h ^ (h >> jnp.uint32(16))) * jnp.uint32(0x7FEB352D)
    h = (h ^ (h >> jnp.uint32(15))) * jnp.uint32(0x846CA68B)
    h = h ^ (h >> jnp.uint32(16))

    # Keep iff uniform-u32 < keep_prob * 2^32 ; survivors scaled by 1/keep_prob.
    keep = h < jnp.uint32(keep_threshold)
    scale = jnp.asarray(1.0 / keep_prob, dtype=y.dtype)
    o_ref[...] = jnp.where(keep, y * scale, jnp.zeros_like(y))


# ---------------------------------------------------------------------------
# Tiling / wrapper
# ---------------------------------------------------------------------------

def _choose_tile_s(S, BD, itemsize, *, target_bytes=4 << 20, min_grid=8):
    """Seq-tile so one x block is ~target_bytes of *padded* VMEM.

    Accounts for (8,128) layout padding on the lane dim, keeps tile_s a
    multiple of the sublane packing (8 for f32, 16 for bf16), and caps the
    tile so the grid retains >= min_grid steps (v7x megacore balance).
    """
    sub = max(1, 32 // itemsize)                      # sublane packing multiple
    lane_padded = pl.cdiv(BD, 128) * 128              # lanes pad to 128
    row_bytes = lane_padded * itemsize
    tile = max(1, target_bytes // row_bytes)
    tile = min(tile, max(sub, pl.cdiv(S, min_grid)))  # keep >= min_grid tiles
    if tile >= S:
        return S                                      # full dim: always legal
    tile = max(sub, (tile // sub) * sub)              # (8,128) block constraint
    return min(tile, S)


def positional_encoding_forward(x, pos_enc, *, dropout_p=0.0, training=False,
                                seed=0, tile_s=None):
    """x: (seq_len, batch, d_model); pos_enc: (max_seq_length, 1, d_model) or (L, d_model)."""
    S, B, D = x.shape
    pe = pos_enc.reshape(pos_enc.shape[0], D)          # (L, D): drop size-1 dim (free)
    L = pe.shape[0]
    assert S <= L, "seq_len must not exceed max_seq_length"
    if pe.dtype != x.dtype:
        # Fallback only; prefer building the table in the model dtype (see build_pos_enc).
        pe = pe.astype(x.dtype)

    if training and dropout_p >= 1.0:
        return jnp.zeros_like(x)                       # degenerate: everything dropped

    BD = B * D
    x2d = x.reshape(S, BD)                             # free row-major view
    itemsize = jnp.dtype(x.dtype).itemsize
    if tile_s is None:
        tile_s = _choose_tile_s(S, BD, itemsize)
    grid = (pl.cdiv(S, tile_s),)

    # index_maps take (*grid_idx, *prefetch_refs); *_ absorbs the optional
    # scalar-prefetch (seed) ref in training mode.
    x_spec = pl.BlockSpec((tile_s, BD), lambda i, *_: (i, 0))
    pe_spec = pl.BlockSpec((tile_s, D), lambda i, *_: (i, 0))
    out_spec = pl.BlockSpec((tile_s, BD), lambda i, *_: (i, 0))

    compiler_params = pltpu.CompilerParams(
        dimension_semantics=("parallel",),      # v7x: shard seq tiles over 2 TCs
        vmem_limit_bytes=48 * 1024 * 1024,      # > default scoped on v5e/v6e, < v7x 64 MiB
    )
    cost = pl.CostEstimate(
        flops=S * BD,
        transcendentals=0,
        bytes_accessed=(2 * S * BD + S * D) * itemsize,
    )
    out_shape = jax.ShapeDtypeStruct((S, BD), x.dtype)

    if (not training) or dropout_p == 0.0:
        kernel = functools.partial(_add_pe_kernel, batch=B)
        out2d = pl.pallas_call(
            kernel,
            out_shape=out_shape,
            grid_spec=pltpu.PrefetchScalarGridSpec(
                num_scalar_prefetch=0,
                grid=grid,
                in_specs=[x_spec, pe_spec],
                out_specs=out_spec,
            ),
            compiler_params=compiler_params,
            cost_estimate=cost,
        )(x2d, pe)
    else:
        keep_prob = 1.0 - float(dropout_p)
        keep_threshold = min(int(round(keep_prob * (1 << 32))), (1 << 32) - 1)
        kernel = functools.partial(
            _add_pe_dropout_kernel, batch=B, tile_s=tile_s,
            keep_threshold=keep_threshold, keep_prob=keep_prob)
        seed_arr = jnp.asarray([seed], dtype=jnp.int32)
        out2d = pl.pallas_call(
            kernel,
            out_shape=out_shape,
            grid_spec=pltpu.PrefetchScalarGridSpec(
                num_scalar_prefetch=1,          # seed lands in SMEM
                grid=grid,
                in_specs=[x_spec, pe_spec],
                out_specs=out_spec,
            ),
            compiler_params=compiler_params,
            cost_estimate=cost,
        )(seed_arr, x2d, pe)

    return out2d.reshape(S, B, D)


if __name__ == "__main__":
    d_model = 32
    max_seq_length = 16
    seq_len = 8
    batch = 2
    dropout_p = 0.1

    key = jax.random.PRNGKey(0)
    x = jax.random.normal(key, (seq_len, batch, d_model), dtype=jnp.float32)
    pos_enc = build_pos_enc(d_model, max_seq_length, dtype=x.dtype)

    # --- Eval mode: dropout is identity -> must match x + pe exactly. ---
    out = positional_encoding_forward(x, pos_enc, dropout_p=dropout_p, training=False)
    out = jax.block_until_ready(out)
    ref = x + pos_enc[:seq_len]
    assert out.shape == (seq_len, batch, d_model)
    assert jnp.allclose(out, ref, atol=1e-6), "eval-mode mismatch vs reference"

    # --- Eval mode with a non-divisible seq_len + forced small tile to
    #     exercise the partial-tile edge masking path (S=12, tile_s=8). ---
    key2 = jax.random.PRNGKey(1)
    x12 = jax.random.normal(key2, (12, batch, d_model), dtype=jnp.float32)
    out12 = positional_encoding_forward(x12, pos_enc, training=False, tile_s=8)
    out12 = jax.block_until_ready(out12)
    ref12 = x12 + pos_enc[:12]
    assert jnp.allclose(out12, ref12, atol=1e-6), "partial-tile mismatch vs reference"

    # --- Training mode: fused inverted dropout.  Surviving elements must equal
    #     (x + pe) / keep_prob; dropped elements are 0.  (Exact PyTorch RNG
    #     stream is not reproducible; only the distributional semantics match.)
    out_tr = positional_encoding_forward(
        x, pos_enc, dropout_p=dropout_p, training=True, seed=0
    )
    out_tr = jax.block_until_ready(out_tr)
    scaled = ref / (1.0 - dropout_p)
    kept = out_tr != 0.0
    assert jnp.allclose(jnp.where(kept, out_tr, scaled), scaled, atol=1e-5), (
        "training-mode kept values do not match (x + pe) / keep_prob"
    )
    assert bool(jnp.any(kept)), "training-mode dropout dropped everything at p=0.1"

    print("KERNEL_OK")
</pallas_src>

<mosaic_0001>
module attributes {stable_mosaic.version = 11 : i64} {
  func.func @_add_pe_kernel(%arg0: i32, %arg1: memref<8x64xf32, #tpu.memory_space<vmem>>, %arg2: memref<8x32xf32, #tpu.memory_space<vmem>>, %arg3: memref<8x64xf32, #tpu.memory_space<vmem>>) attributes {dimension_semantics = [#tpu.dimension_semantics<parallel>], iteration_bounds = array<i64: 1>, scalar_prefetch = 0 : i64, scratch_operands = 0 : i64, tpu.core_type = #tpu.core_type<tc>, window_params = [{transform_indices = @transform_0, window_bounds = array<i64: 8, 64>}, {transform_indices = @transform_1, window_bounds = array<i64: 8, 32>}, {transform_indices = @transform_2, window_bounds = array<i64: 8, 64>}]} {
    %c0 = arith.constant 0 : index
    %c0_0 = arith.constant 0 : index
    %0 = vector.load %arg2[%c0, %c0_0] : memref<8x32xf32, #tpu.memory_space<vmem>>, vector<8x32xf32>
    %1 = tpu.concatenate %0, %0 in 1 : vector<8x32xf32>, vector<8x32xf32> -> vector<8x64xf32>
    %c0_1 = arith.constant 0 : index
    %c0_2 = arith.constant 0 : index
    %2 = vector.load %arg1[%c0_1, %c0_2] : memref<8x64xf32, #tpu.memory_space<vmem>>, vector<8x64xf32>
    %3 = arith.addf %2, %1 : vector<8x64xf32>
    %c0_3 = arith.constant 0 : index
    %c0_4 = arith.constant 0 : index
    %4 = vector.load %arg3[%c0_3, %c0_4] : memref<8x64xf32, #tpu.memory_space<vmem>>, vector<8x64xf32>
    tpu.vector_store %arg3[%c0_3, %c0_4], %3 {strides = array<i32>} : memref<8x64xf32, #tpu.memory_space<vmem>>, vector<8x64xf32>,
    return
  }
  func.func @transform_0(%arg0: i32) -> (i32, i32) {
    %c0_i32 = arith.constant 0 : i32
    %c0_i32_0 = arith.constant 0 : i32
    return %arg0, %c0_i32 : i32, i32
  }
  func.func @transform_1(%arg0: i32) -> (i32, i32) {
    %c0_i32 = arith.constant 0 : i32
    %c0_i32_0 = arith.constant 0 : i32
    return %arg0, %c0_i32 : i32, i32
  }
  func.func @transform_2(%arg0: i32) -> (i32, i32) {
    %c0_i32 = arith.constant 0 : i32
    %c0_i32_0 = arith.constant 0 : i32
    return %arg0, %c0_i32 : i32, i32
  }
}

</mosaic_0001>

<bundles_post_ra>
// kernel: tpu_custom_call.1
= control target key start
LH: loop header
LB: loop body
LE: loop exit
PB: predicated region body
PF: predicated region fallthrough
CT: control target
= control target key end

     0   :  { %7 = vsyncpa [#allocation3], 0  ;;  %s161_s0 = inlined_call_operand.hbm [shape: f32[8,64], index: 0, kind: input, shape index: {}]   ;;  %s162_s1 = inlined_call_operand.hbm [shape: f32[16,32], index: 1, kind: input, shape index: {}]   ;;  %s163_s2 = inlined_call_operand.hbm [shape: f32[8,64], index: 2, kind: output, shape index: {}]  }
   0x1   :  { %8 = vsyncpa [#allocation6], 0 }
   0x2   :  { %9 = vsyncpa [#allocation4], 0  ;;  %s133_s9 = smov [#allocation2]   ;;  %s134_s11 = smov [#allocation5]  }
   0x3   :  { %s16_s10 = sshll.u32 %s133_s9, 4  ;;  %s26_s12 = sshll.u32 %s134_s11, 4  ;;  %s17_s10 = int_to_ptr.vmem [resolvable:$true] %s16_s10  ;;  %s27_s12 = int_to_ptr.vmem [resolvable:$true] %s26_s12 }
   0x4   :  { %s75_s13 = scalar_lea.vmem %s17_s10, 128  ;;  %p80_p1 = scmp.lt.s32.totalorder %s17_s10, %s17_s10 }
   0x5   :  { %p76_p0 = scmp.ne.s32.totalorder %s17_s10, %s75_s13  ;;  %p81_p2 = scmp.lt.s32.totalorder %s75_s13, %s75_s13 }
   0x7   :  { %p82_p3 = por %p81_p2, %p80_p1 }
   0x9   :  { %p83_p4 = pnand %p82_p3, %p76_p0 }
   0xb   :  { %86 = shalt.err (!%p83_p4)
}
   0xc   :  { %19 = dma.hbm_to_vmem [thread:$0]  %s161_s0, 128, %s17_s10, [#allocation3]  }
   0xd   :  { %s95_s16 = scalar_lea.vmem %s27_s12, 128  ;;  %p100_p6 = scmp.lt.s32.totalorder %s27_s12, %s27_s12 }
   0xe   :  { %p96_p5 = scmp.ne.s32.totalorder %s27_s12, %s95_s16  ;;  %p101_p7 = scmp.lt.s32.totalorder %s95_s16, %s95_s16 }
  0x10   :  { %p102_p8 = por %p101_p7, %p100_p6 }
  0x12   :  { %p103_p9 = pnand %p102_p8, %p96_p5 }
  0x14   :  { %106 = shalt.err (!%p103_p9)
}
  0x15   :  { %29 = dma.hbm_to_vmem [thread:$0]  %s162_s1, 128, %s27_s12, [#allocation6]  }
  0x16   :  { %127 = dma.done.wait [#allocation3], 128  }
  0x17   :  { %128 = vsyncadd [#allocation3], 4294967168 }
  0x18   :  { %129 = dma.done.wait [#allocation6], 128  }
  0x19   :  { %130 = vsyncadd [#allocation6], 4294967168  ;;  %v36_v0 = vld [vmem:[#allocation5] sm:$0xff]  ;;  %s135_s19 = smov 32   ;;  %vm41_vm0 = vcmask 261120   ;;  %v43_v1 = vld [vmem:[#allocation2] sm:$0xff] }
  0x1a   :  { %38 = vrot.lane.b32.xlu0 %v36_v0, %s135_s19  ;;  %s136_s0 = smov [#allocation7]   ;;  %vm45_vm1 = vcmask 523264  }
  0x1b   :  { %s53_s20 = sshll.u32 %s136_s0, 4  ;;  %s54_s20 = int_to_ptr.vmem [resolvable:$true] %s53_s20 }
  0x1c   :  { %s107_s21 = scalar_lea.vmem %s54_s20, 128  ;;  %p112_p11 = scmp.lt.s32.totalorder %s54_s20, %s54_s20 }
  0x1d   :  { %p108_p10 = scmp.ne.s32.totalorder %s54_s20, %s107_s21  ;;  %p113_p12 = scmp.lt.s32.totalorder %s107_s21, %s107_s21 }
  0x1f   :  { %p114_p13 = por %p113_p12, %p112_p11 }
  0x21   :  { %p115_p0 = pnand %p114_p13, %p108_p10 }
  0x8c   :  { %v39_v2 = vpop.permute.xlu0 %38 }
  0x8d   :  { %v42_v3 = vsel %vm41_vm0, %v36_v0, %v39_v2 }
  0x8e   :  { %v44_v4 = vadd.f32 %v43_v1, %v42_v3 }
  0x90   :  { %46 = vst.msk [vmem:[#allocation7] sm:$0xff] %vm45_vm1, %v44_v4 }
  0x91   :  { %118 = shalt.err (!%p115_p0)
}
  0x92   :  { %56 = dma.vmem_to_hbm [thread:$0]  %s54_s20, 128, %s163_s2, [#allocation4]  }
  0x93   :  { %131 = dma.done.wait [#allocation4], 128  }
  0x94   :  { %132 = vsyncadd [#allocation4], 4294967168 }
  0x95   :  { %60 = vsyncpa [#allocation3], 1 }
  0x96   :  { %61 = vsyncpa [#allocation6], 1 }
  0x97   :  { %62 = vsyncpa [#allocation4], 1 }

</bundles_post_ra>
